<compile_context>
chip_gen: v5e
topology: v5e:2x2
jax: 0.10.0
libtpu: 0.0.40
codegen_flags: <defaults>
</compile_context>

<pallas_src>
import functools
from typing import NamedTuple

import jax
import jax.numpy as jnp
from jax.experimental import pallas as pl
from jax.experimental.pallas import tpu as pltpu


def _cdiv(a, b):
    return -(-a // b)


def _round_up(v, m):
    return ((v + m - 1) // m) * m


def _fit_tile(dim, target, align):
    """Split `dim` into cdiv(dim, target) equal-ish `align`-aligned tiles.

    Avoids the pathological padding of round_up(dim, target) when dim is just
    above a multiple of target (e.g. dim=300, target=256 -> 2 tiles of 152,
    not one padded 512).  Returns (tile, padded_dim).
    """
    if dim <= 0:
        return align, align
    n_tiles = _cdiv(dim, target)
    tile = _round_up(_cdiv(dim, n_tiles), align)
    return tile, n_tiles * tile


@functools.lru_cache(maxsize=1)
def _hw_defaults():
    """(tm, tn, tk, vmem_limit_bytes) keyed off this chip's VMEM capacity."""
    vmem_cap = 0
    try:
        vmem_cap = int(pltpu.get_tpu_info().vmem_capacity_bytes)
    except Exception:
        vmem_cap = 0
    if vmem_cap >= 96 * 1024 * 1024:
        # v5e / v6e: 128 MiB VMEM. Big tiles push the base GEMM past the
        # HBM/MXU crossover (~240 FLOP/byte on v5e, ~650 on v6e).
        return 512, 1024, 1024, 64 * 1024 * 1024
    # v7x (64 MiB VMEM/TC) or unknown: conservative tiles, lower scoped limit.
    # ~310 FLOP/byte already reaches compute-bound at 3.2 TB/s HBM.
    return 512, 512, 1024, 44 * 1024 * 1024


class LoRAParams(NamedTuple):
    wt: jax.Array       # (k_pad, n_pad) compute dtype, W pre-transposed, lane-dense in N
    bias2d: jax.Array   # (1, n_pad) f32
    a: jax.Array        # (k_pad, r_pad) compute dtype
    b: jax.Array        # (r_pad, n_pad) compute dtype, scaling already folded in (in f32)
    in_features: int
    out_features: int
    tk: int
    tn: int
    r_pad: int


def prepare_lora_params(w, bias, a, b, *, scaling, compute_dtype=jnp.bfloat16,
                        tn=None, tk=None):
    """One-time prep of the frozen / slow-moving parameters.

    Hoists transpose / pad / cast / scaling-fold out of the per-call forward so
    each forward only streams the already-laid-out (K, N) weight from HBM.
    """
    out_features, in_features = w.shape
    r = a.shape[1]
    _, d_tn, d_tk, _ = _hw_defaults()
    tn = d_tn if tn is None else tn
    tk = d_tk if tk is None else tk

    tn_e, n_pad = _fit_tile(out_features, tn, 128)
    tk_e, k_pad = _fit_tile(in_features, tk, 128)
    r_pad = _round_up(r, 128)

    wt = jnp.pad(jnp.transpose(w),
                 ((0, k_pad - in_features), (0, n_pad - out_features))
                 ).astype(compute_dtype)
    bias2d = jnp.pad(bias.reshape(1, -1),
                     ((0, 0), (0, n_pad - out_features))).astype(jnp.float32)
    ap = jnp.pad(a, ((0, k_pad - in_features), (0, r_pad - r))).astype(compute_dtype)
    b_scaled = b.astype(jnp.float32) * jnp.float32(scaling)   # fold scale in f32
    bp = jnp.pad(b_scaled, ((0, r_pad - r), (0, n_pad - out_features))
                 ).astype(compute_dtype)

    return LoRAParams(wt, bias2d, ap, bp, in_features, out_features,
                      tk_e, tn_e, r_pad)


def _lora_fused_kernel(x_ref, wt_ref, bias_ref, a_ref, b_ref, o_ref,
                       acc_ref, xa_ref):
    j = pl.program_id(1)
    k = pl.program_id(2)

    @pl.when(k == 0)
    def _():
        acc_ref[...] = jnp.zeros_like(acc_ref)

    # Base frozen linear: accumulate x-tile @ (W^T)-tile on the MXU in f32.
    acc_ref[...] += jnp.dot(x_ref[...], wt_ref[...],
                            preferred_element_type=jnp.float32)

    # Fused LoRA down-projection: xa = x @ A, computed once per M tile during
    # the j==0 sweep over k; xa_ref persists in VMEM for all later j of this i
    # (k is the innermost grid axis, j the middle one).
    @pl.when(jnp.logical_and(j == 0, k == 0))
    def _():
        xa_ref[...] = jnp.zeros_like(xa_ref)

    @pl.when(j == 0)
    def _():
        xa_ref[...] += jnp.dot(x_ref[...], a_ref[...],
                               preferred_element_type=jnp.float32)

    @pl.when(k == pl.num_programs(2) - 1)
    def _():
        # Epilogue, once per (M, N) tile: rank-r up-projection (scaling folded
        # into B), bias add, final cast.  xa is down-cast to the MXU feed dtype
        # (fast bf16 path on v6e/v7x); accumulation/adds stay f32 (v5e-safe).
        lora = jnp.dot(xa_ref[...].astype(b_ref.dtype), b_ref[...],
                       preferred_element_type=jnp.float32)
        o_ref[...] = (acc_ref[...] + bias_ref[...] + lora).astype(o_ref.dtype)


def lora_linear_apply(x, params: LoRAParams, *, tm=None, vmem_limit_bytes=None):
    """x: (..., in_features) -> (..., out_features), using prepared params."""
    out_dtype = x.dtype
    compute_dtype = params.wt.dtype
    in_features, out_features = params.in_features, params.out_features
    k_pad, n_pad = params.wt.shape
    r_pad = params.r_pad
    tk_e, tn_e = params.tk, params.tn

    lead = x.shape[:-1]
    x2d = x.reshape(-1, in_features)
    m = x2d.shape[0]

    d_tm, _, _, d_vmem = _hw_defaults()
    tm = d_tm if tm is None else tm
    # 16-row alignment covers both f32 (8,128) and bf16 (16,128) sublane packing.
    tm_e, m_pad = _fit_tile(m, tm, 16)

    # Zero padding keeps the math exact; padded rows/cols are sliced off below.
    xp = jnp.pad(x2d, ((0, m_pad - m), (0, k_pad - in_features))
                 ).astype(compute_dtype)

    cbytes = jnp.dtype(compute_dtype).itemsize
    obytes = jnp.dtype(out_dtype).itemsize
    # Double-buffered inputs + outputs + scratch; auto-raise the scoped limit
    # (up to what's needed) instead of failing on user-supplied large tiles.
    need = (2 * (tm_e * tk_e * cbytes + tk_e * tn_e * cbytes + tn_e * 4
                 + tk_e * r_pad * cbytes + r_pad * tn_e * cbytes)
            + 2 * tm_e * tn_e * obytes
            + tm_e * tn_e * 4 + tm_e * r_pad * 4)
    if vmem_limit_bytes is None:
        vmem_limit_bytes = max(d_vmem, need + (4 << 20))

    grid = (m_pad // tm_e, n_pad // tn_e, k_pad // tk_e)

    out2d = pl.pallas_call(
        _lora_fused_kernel,
        out_shape=jax.ShapeDtypeStruct((m_pad, n_pad), out_dtype),
        grid_spec=pltpu.PrefetchScalarGridSpec(
            num_scalar_prefetch=0,
            grid=grid,
            in_specs=[
                pl.BlockSpec((tm_e, tk_e), lambda i, j, k: (i, k)),    # x
                pl.BlockSpec((tk_e, tn_e), lambda i, j, k: (k, j)),    # W^T (pre-transposed)
                pl.BlockSpec((1, tn_e), lambda i, j, k: (0, j)),       # bias (epilogue only)
                pl.BlockSpec((tk_e, r_pad), lambda i, j, k: (k, 0)),   # A  (j==0 sweep only)
                pl.BlockSpec((r_pad, tn_e), lambda i, j, k: (0, j)),   # B * scaling
            ],
            out_specs=pl.BlockSpec((tm_e, tn_e), lambda i, j, k: (i, j)),
            scratch_shapes=[
                pltpu.VMEM((tm_e, tn_e), jnp.float32),   # base-GEMM accumulator
                pltpu.VMEM((tm_e, r_pad), jnp.float32),  # persistent xa = x @ A
            ],
        ),
        compiler_params=pltpu.CompilerParams(
            # Only M is parallel: the fused xa scratch carries a sequential
            # j/k dependency, so megacore sharding must keep each M tile's
            # full (j, k) sweep on one TensorCore.
            dimension_semantics=("parallel", "arbitrary", "arbitrary"),
            vmem_limit_bytes=int(vmem_limit_bytes),
        ),
        cost_estimate=pl.CostEstimate(
            flops=(2 * m_pad * n_pad * k_pad        # base GEMM
                   + 2 * m_pad * k_pad * r_pad      # down-projection
                   + 2 * m_pad * r_pad * n_pad),    # up-projection
            transcendentals=0,
            bytes_accessed=int(
                xp.size * cbytes + params.wt.size * cbytes
                + params.bias2d.size * 4 + params.a.size * cbytes
                + params.b.size * cbytes + m_pad * n_pad * obytes),
        ),
    )(xp, params.wt, params.bias2d, params.a, params.b)

    return out2d[:m, :out_features].reshape(*lead, out_features)


def lora_linear_forward(x, w, bias, a, b, *, scaling, compute_dtype=None,
                        tm=None, tn=None, tk=None):
    """Convenience one-shot wrapper (prep + apply).

    For repeated calls with frozen weights, call `prepare_lora_params` once
    and reuse the result with `lora_linear_apply`.
    """
    if compute_dtype is None:
        # Feed the MXU bf16 when x arrives as f32: full-rate MXU on
        # v5e/v6e/v7x and half the W/x HBM bytes. Accumulation stays f32.
        compute_dtype = jnp.bfloat16 if x.dtype == jnp.float32 else x.dtype
    params = prepare_lora_params(w, bias, a, b, scaling=scaling,
                                 compute_dtype=compute_dtype, tn=tn, tk=tk)
    return lora_linear_apply(x, params, tm=tm)


def reference_forward(x, w, bias, a, b, *, scaling):
    base = jnp.einsum("...k,nk->...n", x, w) + bias
    lora = (x @ a) @ b
    return base + scaling * lora


if __name__ == "__main__":
    # Module hyper-params (deterministic, in-script init).
    batch, seq = 2, 8
    in_features, out_features = 32, 48
    r, lora_alpha = 4, 8
    scaling = lora_alpha / r

    key = jax.random.PRNGKey(0)
    kx, kw, kb, ka, kbb = jax.random.split(key, 5)

    x = jax.random.normal(kx, (batch, seq, in_features), dtype=jnp.float32)

    # Frozen base nn.Linear params: W (out, in), bias (out,)
    bound = 1.0 / jnp.sqrt(in_features)
    w = jax.random.uniform(kw, (out_features, in_features), jnp.float32, -bound, bound)
    bias = jax.random.uniform(kb, (out_features,), jnp.float32, -bound, bound)

    # LoRA params: A (in, r), B (r, out), init = randn * 0.02
    a = jax.random.normal(ka, (in_features, r), dtype=jnp.float32) * 0.02
    b = jax.random.normal(kbb, (r, out_features), dtype=jnp.float32) * 0.02

    y_ref = reference_forward(x, w, bias, a, b, scaling=scaling)

    # Explicit f32 MXU-feed path: tight check vs reference.
    y_f32 = lora_linear_forward(x, w, bias, a, b, scaling=scaling,
                                compute_dtype=jnp.float32)
    y_f32 = jax.block_until_ready(y_f32)
    assert y_f32.shape == (batch, seq, out_features)
    assert jnp.allclose(y_f32, y_ref, atol=1e-5, rtol=1e-5), "f32 path mismatch vs reference"

    # Default production path: frozen-param prep hoisted once, bf16 MXU feed,
    # f32 accumulation / epilogue.
    params = prepare_lora_params(w, bias, a, b, scaling=scaling)
    y = lora_linear_apply(x, params)
    y = jax.block_until_ready(y)
    assert y.shape == (batch, seq, out_features)
    assert jnp.allclose(y, y_ref, atol=5e-2, rtol=5e-2), "bf16 path mismatch vs reference"

    print("KERNEL_OK")
</pallas_src>

<mosaic_0001>
module attributes {stable_mosaic.version = 11 : i64} {
  func.func @_lora_fused_kernel(%arg0: i32, %arg1: i32, %arg2: i32, %arg3: memref<16x128xf32, #tpu.memory_space<vmem>>, %arg4: memref<128x128xf32, #tpu.memory_space<vmem>>, %arg5: memref<1x128xf32, #tpu.memory_space<vmem>>, %arg6: memref<128x128xf32, #tpu.memory_space<vmem>>, %arg7: memref<128x128xf32, #tpu.memory_space<vmem>>, %arg8: memref<16x128xf32, #tpu.memory_space<vmem>>, %arg9: memref<16x128xf32, #tpu.memory_space<vmem>>, %arg10: memref<16x128xf32, #tpu.memory_space<vmem>>) attributes {dimension_semantics = [#tpu.dimension_semantics<parallel>, #tpu.dimension_semantics<arbitrary>, #tpu.dimension_semantics<arbitrary>], iteration_bounds = array<i64: 1, 1, 1>, scalar_prefetch = 0 : i64, scratch_operands = 2 : i64, tpu.core_type = #tpu.core_type<tc>, window_params = [{transform_indices = @transform_0, window_bounds = array<i64: 16, 128>}, {transform_indices = @transform_1, window_bounds = array<i64: 128, 128>}, {transform_indices = @transform_2, window_bounds = array<i64: 1, 128>}, {transform_indices = @transform_3, window_bounds = array<i64: 128, 128>}, {transform_indices = @transform_4, window_bounds = array<i64: 128, 128>}, {transform_indices = @transform_5, window_bounds = array<i64: 16, 128>}]} {
    %c0_i32 = arith.constant 0 : i32
    %0 = arith.cmpi eq, %arg2, %c0_i32 : i32
    %1 = arith.extui %0 : i1 to i32
    %c0_i32_0 = arith.constant 0 : i32
    %2 = arith.cmpi ne, %1, %c0_i32_0 : i32
    scf.if %2 {
      %cst_15 = arith.constant 0.000000e+00 : f32
      %20 = vector.broadcast %cst_15 : f32 to vector<16x128xf32>
      %c0_16 = arith.constant 0 : index
      %c0_17 = arith.constant 0 : index
      %21 = vector.load %arg9[%c0_16, %c0_17] : memref<16x128xf32, #tpu.memory_space<vmem>>, vector<16x128xf32>
      tpu.vector_store %arg9[%c0_16, %c0_17], %20 {strides = array<i32>} : memref<16x128xf32, #tpu.memory_space<vmem>>, vector<16x128xf32>,
    } else {
    }
    %c0 = arith.constant 0 : index
    %c0_1 = arith.constant 0 : index
    %3 = vector.load %arg9[%c0, %c0_1] : memref<16x128xf32, #tpu.memory_space<vmem>>, vector<16x128xf32>
    %c0_2 = arith.constant 0 : index
    %c0_3 = arith.constant 0 : index
    %4 = vector.load %arg3[%c0_2, %c0_3] : memref<16x128xf32, #tpu.memory_space<vmem>>, vector<16x128xf32>
    %c0_4 = arith.constant 0 : index
    %c0_5 = arith.constant 0 : index
    %5 = vector.load %arg4[%c0_4, %c0_5] : memref<128x128xf32, #tpu.memory_space<vmem>>, vector<128x128xf32>
    %cst = arith.constant dense<0.000000e+00> : vector<16x128xf32>
    %6 = tpu.matmul %4, %5, %cst {dimension_numbers = #tpu.dot_dimension_numbers<[1], [0], [0], [1], [0, 0, 1, 1], [], []>} : vector<16x128xf32>, vector<128x128xf32>, vector<16x128xf32> -> vector<16x128xf32>
    %7 = arith.addf %3, %6 : vector<16x128xf32>
    %c0_6 = arith.constant 0 : index
    %c0_7 = arith.constant 0 : index
    %8 = vector.load %arg9[%c0_6, %c0_7] : memref<16x128xf32, #tpu.memory_space<vmem>>, vector<16x128xf32>
    tpu.vector_store %arg9[%c0_6, %c0_7], %7 {strides = array<i32>} : memref<16x128xf32, #tpu.memory_space<vmem>>, vector<16x128xf32>,
    %c0_i32_8 = arith.constant 0 : i32
    %9 = arith.cmpi eq, %arg1, %c0_i32_8 : i32
    %c0_i32_9 = arith.constant 0 : i32
    %10 = arith.cmpi eq, %arg2, %c0_i32_9 : i32
    %11 = arith.andi %9, %10 : i1
    %12 = arith.extui %11 : i1 to i32
    %c0_i32_10 = arith.constant 0 : i32
    %13 = arith.cmpi ne, %12, %c0_i32_10 : i32
    scf.if %13 {
      %cst_15 = arith.constant 0.000000e+00 : f32
      %20 = vector.broadcast %cst_15 : f32 to vector<16x128xf32>
      %c0_16 = arith.constant 0 : index
      %c0_17 = arith.constant 0 : index
      %21 = vector.load %arg10[%c0_16, %c0_17] : memref<16x128xf32, #tpu.memory_space<vmem>>, vector<16x128xf32>
      tpu.vector_store %arg10[%c0_16, %c0_17], %20 {strides = array<i32>} : memref<16x128xf32, #tpu.memory_space<vmem>>, vector<16x128xf32>,
    } else {
    }
    %c0_i32_11 = arith.constant 0 : i32
    %14 = arith.cmpi eq, %arg1, %c0_i32_11 : i32
    %15 = arith.extui %14 : i1 to i32
    %c0_i32_12 = arith.constant 0 : i32
    %16 = arith.cmpi ne, %15, %c0_i32_12 : i32
    scf.if %16 {
      %c0_15 = arith.constant 0 : index
      %c0_16 = arith.constant 0 : index
      %20 = vector.load %arg10[%c0_15, %c0_16] : memref<16x128xf32, #tpu.memory_space<vmem>>, vector<16x128xf32>
      %c0_17 = arith.constant 0 : index
      %c0_18 = arith.constant 0 : index
      %21 = vector.load %arg3[%c0_17, %c0_18] : memref<16x128xf32, #tpu.memory_space<vmem>>, vector<16x128xf32>
      %c0_19 = arith.constant 0 : index
      %c0_20 = arith.constant 0 : index
      %22 = vector.load %arg6[%c0_19, %c0_20] : memref<128x128xf32, #tpu.memory_space<vmem>>, vector<128x128xf32>
      %cst_21 = arith.constant dense<0.000000e+00> : vector<16x128xf32>
      %23 = tpu.matmul %21, %22, %cst_21 {dimension_numbers = #tpu.dot_dimension_numbers<[1], [0], [0], [1], [0, 0, 1, 1], [], []>} : vector<16x128xf32>, vector<128x128xf32>, vector<16x128xf32> -> vector<16x128xf32>
      %24 = arith.addf %20, %23 : vector<16x128xf32>
      %c0_22 = arith.constant 0 : index
      %c0_23 = arith.constant 0 : index
      %25 = vector.load %arg10[%c0_22, %c0_23] : memref<16x128xf32, #tpu.memory_space<vmem>>, vector<16x128xf32>
      tpu.vector_store %arg10[%c0_22, %c0_23], %24 {strides = array<i32>} : memref<16x128xf32, #tpu.memory_space<vmem>>, vector<16x128xf32>,
    } else {
    }
    %c0_i32_13 = arith.constant 0 : i32
    %17 = arith.cmpi eq, %arg2, %c0_i32_13 : i32
    %18 = arith.extui %17 : i1 to i32
    %c0_i32_14 = arith.constant 0 : i32
    %19 = arith.cmpi ne, %18, %c0_i32_14 : i32
    scf.if %19 {
      %c0_15 = arith.constant 0 : index
      %c0_16 = arith.constant 0 : index
      %20 = vector.load %arg10[%c0_15, %c0_16] : memref<16x128xf32, #tpu.memory_space<vmem>>, vector<16x128xf32>
      %c0_17 = arith.constant 0 : index
      %c0_18 = arith.constant 0 : index
      %21 = vector.load %arg7[%c0_17, %c0_18] : memref<128x128xf32, #tpu.memory_space<vmem>>, vector<128x128xf32>
      %cst_19 = arith.constant dense<0.000000e+00> : vector<16x128xf32>
      %22 = tpu.matmul %20, %21, %cst_19 {dimension_numbers = #tpu.dot_dimension_numbers<[1], [0], [0], [1], [0, 0, 1, 1], [], []>} : vector<16x128xf32>, vector<128x128xf32>, vector<16x128xf32> -> vector<16x128xf32>
      %c0_20 = arith.constant 0 : index
      %c0_21 = arith.constant 0 : index
      %23 = vector.load %arg9[%c0_20, %c0_21] : memref<16x128xf32, #tpu.memory_space<vmem>>, vector<16x128xf32>
      %c0_22 = arith.constant 0 : index
      %c0_23 = arith.constant 0 : index
      %24 = vector.load %arg5[%c0_22, %c0_23] : memref<1x128xf32, #tpu.memory_space<vmem>>, vector<1x128xf32>
      %25 = vector.broadcast %24 : vector<1x128xf32> to vector<16x128xf32>
      %26 = arith.addf %23, %25 : vector<16x128xf32>
      %27 = arith.addf %26, %22 : vector<16x128xf32>
      %c0_24 = arith.constant 0 : index
      %c0_25 = arith.constant 0 : index
      %28 = vector.load %arg8[%c0_24, %c0_25] : memref<16x128xf32, #tpu.memory_space<vmem>>, vector<16x128xf32>
      tpu.vector_store %arg8[%c0_24, %c0_25], %27 {strides = array<i32>} : memref<16x128xf32, #tpu.memory_space<vmem>>, vector<16x128xf32>,
    } else {
    }
    return
  }
  func.func @transform_0(%arg0: i32, %arg1: i32, %arg2: i32) -> (i32, i32) {
    %c0_i32 = arith.constant 0 : i32
    return %arg0, %arg2 : i32, i32
  }
  func.func @transform_1(%arg0: i32, %arg1: i32, %arg2: i32) -> (i32, i32) {
    %c0_i32 = arith.constant 0 : i32
    return %arg2, %arg1 : i32, i32
  }
  func.func @transform_2(%arg0: i32, %arg1: i32, %arg2: i32) -> (i32, i32) {
    %c0_i32 = arith.constant 0 : i32
    %c0_i32_0 = arith.constant 0 : i32
    return %c0_i32, %arg1 : i32, i32
  }
  func.func @transform_3(%arg0: i32, %arg1: i32, %arg2: i32) -> (i32, i32) {
    %c0_i32 = arith.constant 0 : i32
    %c0_i32_0 = arith.constant 0 : i32
    return %arg2, %c0_i32 : i32, i32
  }
  func.func @transform_4(%arg0: i32, %arg1: i32, %arg2: i32) -> (i32, i32) {
    %c0_i32 = arith.constant 0 : i32
    %c0_i32_0 = arith.constant 0 : i32
    return %c0_i32, %arg1 : i32, i32
  }
  func.func @transform_5(%arg0: i32, %arg1: i32, %arg2: i32) -> (i32, i32) {
    %c0_i32 = arith.constant 0 : i32
    return %arg0, %arg1 : i32, i32
  }
}

</mosaic_0001>

<bundles_post_ra>
// kernel: tpu_custom_call.1
= control target key start
LH: loop header
LB: loop body
LE: loop exit
PB: predicated region body
PF: predicated region fallthrough
CT: control target
= control target key end

     0   :  { %10 = vsyncpa [#allocation5], 0  ;;  %s493_s0 = inlined_call_operand.hbm [shape: f32[16,128], index: 0, kind: input, shape index: {}]   ;;  %s494_s1 = inlined_call_operand.hbm [shape: f32[128,128], index: 1, kind: input, shape index: {}]   ;;  %s495_s2 = inlined_call_operand.vmem [shape: f32[1,128], index: 2, kind: input, shape index: {}]   ;;  %s496_s3 = inlined_call_operand.hbm [shape: f32[128,128], index: 3, kind: input, shape index: {}]   ;;  %s497_s4 = inlined_call_operand.hbm [shape: f32[128,128], index: 4, kind: input, shape index: {}]   ;;  %s498_s5 = inlined_call_operand.hbm [shape: f32[16,128], index: 5, kind: output, shape index: {}]  }
   0x1   :  { %11 = vsyncpa [#allocation8], 0 }
   0x2   :  { %12 = vsyncpa [#allocation11], 0 }
   0x3   :  { %13 = vsyncpa [#allocation6], 0  ;;  %s31_s20 = sshll.u32 %s494_s1, 4  ;;  %s423_s21 = smov [#allocation7]   ;;  %s32_s20 = int_to_ptr.hbm [resolvable:$true] %s31_s20 }
   0x4   :  { %s33_s22 = sshll.u32 %s423_s21, 4  ;;  %s18_s25 = sshll.u32 %s493_s0, 4  ;;  %s34_s22 = int_to_ptr.vmem [resolvable:$true] %s33_s22  ;;  %s19_s25 = int_to_ptr.hbm [resolvable:$true] %s18_s25 }
   0x5   :  { %s424_s26 = smov 128   ;;  %s425_s27 = smov 8  }
   0x6   :  { %39 = dma.hbm_to_vmem [thread:$0]  %s32_s20, 2048, %s34_s22, [#allocation8], %s424_s26, %s424_s26, %s425_s27  }
   0x7   :  { %s426_s28 = smov [#allocation4]   ;;  %s46_s1 = sshll.u32 %s496_s3, 4  ;;  %s47_s1 = int_to_ptr.hbm [resolvable:$true] %s46_s1 }
   0x8   :  { %s20_s29 = sshll.u32 %s426_s28, 4  ;;  %s59_s8 = sshll.u32 %s497_s4, 4  ;;  %s21_s29 = int_to_ptr.vmem [resolvable:$true] %s20_s29  ;;  %s60_s8 = int_to_ptr.hbm [resolvable:$true] %s59_s8 }
   0x9   :  { %26 = dma.hbm_to_vmem [thread:$0]  %s19_s25, 256, %s21_s29, [#allocation5], %s424_s26, %s424_s26, %s425_s27  }
   0xa   :  { %s427_s9 = smov [#allocation9]   ;;  %s428_s11 = smov [#allocation10]  }
   0xb   :  { %s48_s10 = sshll.u32 %s427_s9, 4  ;;  %s61_s3 = sshll.u32 %s428_s11, 4  ;;  %s49_s10 = int_to_ptr.vmem [resolvable:$true] %s48_s10  ;;  %s62_s3 = int_to_ptr.vmem [resolvable:$true] %s61_s3 }
   0xc   :  { %54 = dma.hbm_to_vmem [thread:$0]  %s47_s1, 2048, %s49_s10, [#allocation8], %s424_s26, %s424_s26, %s425_s27  }
   0xd   :  { %67 = dma.hbm_to_vmem [thread:$0]  %s60_s8, 2048, %s62_s3, [#allocation11], %s424_s26, %s424_s26, %s425_s27  }
   0xe   :  { %415 = dma.done.wait [#allocation5], 256  }
   0xf   :  { %416 = vsyncadd [#allocation5], 4294967040 }
  0x10   :  { %417 = dma.done.wait [#allocation8], 4096  }
  0x11   :  { %418 = vsyncadd [#allocation8], 4294963200 }
  0x12   :  { %419 = dma.done.wait [#allocation11], 2048  }
  0x13   :  { %420 = vsyncadd [#allocation11], 4294965248  ;;  %v166_v0 = vld [vmem:[#allocation9 + $0x78] sm:$0xff]  ;;  %v165_v1 = vld [vmem:[#allocation9 + $0x70] sm:$0xff]  ;;  %s429_s13 = smov [#allocation12]   ;;  %s256_s17 = sshll.u32 %s498_s5, 4  ;;  %s257_s17 = int_to_ptr.hbm [resolvable:$true] %s256_s17 }
  0x14   :  { %167 = vmatpush.msra.mxu1 %v166_v0  ;;  %v164_v2 = vld [vmem:[#allocation9 + $0x68] sm:$0xff]  ;;  %v163_v3 = vld [vmem:[#allocation9 + $0x60] sm:$0xff]  ;;  %v162_v4 = vld [vmem:[#allocation9 + $0x58] sm:$0xff]  ;;  %s254_s14 = sshll.u32 %s429_s13, 4  ;;  %s255_s14 = int_to_ptr.vmem [resolvable:$true] %s254_s14 }
  0x15   :  { %v161_v5 = vld [vmem:[#allocation9 + $0x50] sm:$0xff]  ;;  %v214_v6 = vld [vmem:[#allocation10 + $0x78] sm:$0xff]  ;;  %v160_v10 = vld [vmem:[#allocation9 + $0x48] sm:$0xff] }
  0x16   :  { %168 = vmatpush.msra.mxu1 %v165_v1  ;;  %v213_v7 = vld [vmem:[#allocation10 + $0x70] sm:$0xff]  ;;  %v109_v8 = vld [vmem:[#allocation7 + $0x78] sm:$0xff]  ;;  %215 = vmatpush.msra.mxu2 %v214_v6  ;;  %v212_v11 = vld [vmem:[#allocation10 + $0x68] sm:$0xff] }
  0x17   :  { %v108_v9 = vld [vmem:[#allocation7 + $0x70] sm:$0xff]  ;;  %110 = vmatpush.msra.mxu0 %v109_v8  ;;  %271 = vmatpush.msra.mxu3 %v109_v8  ;;  %v107_v12 = vld [vmem:[#allocation7 + $0x68] sm:$0xff]  ;;  %v159_v13 = vld [vmem:[#allocation9 + $0x40] sm:$0xff] }
  0x18   :  { %169 = vmatpush.msra.mxu1 %v164_v2  ;;  %216 = vmatpush.msra.mxu2 %v213_v7  ;;  %v211_v14 = vld [vmem:[#allocation10 + $0x60] sm:$0xff]  ;;  %v158_v16 = vld [vmem:[#allocation9 + $0x38] sm:$0xff]  ;;  %v157_v19 = vld [vmem:[#allocation9 + $0x30] sm:$0xff] }
  0x19   :  { %111 = vmatpush.msra.mxu0 %v108_v9  ;;  %272 = vmatpush.msra.mxu3 %v108_v9  ;;  %v106_v15 = vld [vmem:[#allocation7 + $0x60] sm:$0xff]  ;;  %v210_v17 = vld [vmem:[#allocation10 + $0x58] sm:$0xff]  ;;  %v209_v20 = vld [vmem:[#allocation10 + $0x50] sm:$0xff] }
  0x1a   :  { %170 = vmatpush.msra.mxu1 %v163_v3  ;;  %217 = vmatpush.msra.mxu2 %v212_v11  ;;  %v105_v18 = vld [vmem:[#allocation7 + $0x58] sm:$0xff]  ;;  %v104_v21 = vld [vmem:[#allocation7 + $0x50] sm:$0xff]  ;;  %v156_v22 = vld [vmem:[#allocation9 + $0x28] sm:$0xff] }
  0x1b   :  { %112 = vmatpush.msra.mxu0 %v107_v12  ;;  %273 = vmatpush.msra.mxu3 %v107_v12  ;;  %v208_v23 = vld [vmem:[#allocation10 + $0x48] sm:$0xff]  ;;  %v155_v25 = vld [vmem:[#allocation9 + $0x20] sm:$0xff]  ;;  %v154_v28 = vld [vmem:[#allocation9 + $0x18] sm:$0xff] }
  0x1c   :  { %171 = vmatpush.msra.mxu1 %v162_v4  ;;  %218 = vmatpush.msra.mxu2 %v211_v14  ;;  %v103_v24 = vld [vmem:[#allocation7 + $0x48] sm:$0xff]  ;;  %v207_v26 = vld [vmem:[#allocation10 + $0x40] sm:$0xff]  ;;  %v206_v29 = vld [vmem:[#allocation10 + $0x38] sm:$0xff] }
  0x1d   :  { %113 = vmatpush.msra.mxu0 %v106_v15  ;;  %274 = vmatpush.msra.mxu3 %v106_v15  ;;  %v102_v27 = vld [vmem:[#allocation7 + $0x40] sm:$0xff]  ;;  %v101_v30 = vld [vmem:[#allocation7 + $0x38] sm:$0xff]  ;;  %v153_v31 = vld [vmem:[#allocation9 + $0x10] sm:$0xff] }
  0x1e   :  { %172 = vmatpush.msra.mxu1 %v161_v5  ;;  %219 = vmatpush.msra.mxu2 %v210_v17  ;;  %v205_v32 = vld [vmem:[#allocation10 + $0x30] sm:$0xff]  ;;  %v152_v34 = vld [vmem:[#allocation9 + $0x8] sm:$0xff]  ;;  %v151_v37 = vld [vmem:[#allocation9] sm:$0xff] }
  0x1f   :  { %114 = vmatpush.msra.mxu0 %v105_v18  ;;  %275 = vmatpush.msra.mxu3 %v105_v18  ;;  %v100_v33 = vld [vmem:[#allocation7 + $0x30] sm:$0xff]  ;;  %v204_v35 = vld [vmem:[#allocation10 + $0x28] sm:$0xff]  ;;  %v203_v38 = vld [vmem:[#allocation10 + $0x20] sm:$0xff] }
  0x20   :  { %173 = vmatpush.msra.mxu1 %v160_v10  ;;  %220 = vmatpush.msra.mxu2 %v209_v20  ;;  %v99_v36 = vld [vmem:[#allocation7 + $0x28] sm:$0xff]  ;;  %v149_v39 = vld [vmem:[#allocation4] sm:$0xff]  ;;  %v98_v40 = vld [vmem:[#allocation7 + $0x20] sm:$0xff] }
  0x21   :  { %115 = vmatpush.msra.mxu0 %v104_v21  ;;  %276 = vmatpush.msra.mxu3 %v104_v21  ;;  %v202_v41 = vld [vmem:[#allocation10 + $0x18] sm:$0xff]  ;;  %v201_v43 = vld [vmem:[#allocation10 + $0x10] sm:$0xff]  ;;  %v200_v45 = vld [vmem:[#allocation10 + $0x8] sm:$0xff] }
  0x22   :  { %174 = vmatpush.msra.mxu1 %v159_v13  ;;  %221 = vmatpush.msra.mxu2 %v208_v23  ;;  %v97_v42 = vld [vmem:[#allocation7 + $0x18] sm:$0xff]  ;;  %v96_v44 = vld [vmem:[#allocation7 + $0x10] sm:$0xff]  ;;  %v199_v47 = vld [vmem:[#allocation10] sm:$0xff] }
  0x23   :  { %116 = vmatpush.msra.mxu0 %v103_v24  ;;  %277 = vmatpush.msra.mxu3 %v103_v24  ;;  %v150_v46 = vld [vmem:[#allocation4 + $0x8] sm:$0xff]  ;;  %v95_v48 = vld [vmem:[#allocation7 + $0x8] sm:$0xff]  ;;  %v94_v49 = vld [vmem:[#allocation7] sm:$0xff] }
  0x24   :  { %175 = vmatpush.msra.mxu1 %v158_v16  ;;  %222 = vmatpush.msra.mxu2 %v207_v26  ;;  %v294_v52 = vld [vmem:[%s495_s2] ss:$0 sm:$0xff] }
  0x25   :  { %117 = vmatpush.msra.mxu0 %v102_v27  ;;  %278 = vmatpush.msra.mxu3 %v102_v27 }
  0x26   :  { %176 = vmatpush.msra.mxu1 %v157_v19  ;;  %223 = vmatpush.msra.mxu2 %v206_v29 }
  0x27   :  { %118 = vmatpush.msra.mxu0 %v101_v30  ;;  %279 = vmatpush.msra.mxu3 %v101_v30 }
  0x28   :  { %177 = vmatpush.msra.mxu1 %v156_v22  ;;  %224 = vmatpush.msra.mxu2 %v205_v32 }
  0x29   :  { %119 = vmatpush.msra.mxu0 %v100_v33  ;;  %280 = vmatpush.msra.mxu3 %v100_v33 }
  0x2a   :  { %178 = vmatpush.msra.mxu1 %v155_v25  ;;  %225 = vmatpush.msra.mxu2 %v204_v35 }
  0x2b   :  { %120 = vmatpush.msra.mxu0 %v99_v36  ;;  %281 = vmatpush.msra.mxu3 %v99_v36 }
  0x2c   :  { %179 = vmatpush.msra.mxu1 %v154_v28  ;;  %226 = vmatpush.msra.mxu2 %v203_v38 }
  0x2d   :  { %121 = vmatpush.msra.mxu0 %v98_v40  ;;  %282 = vmatpush.msra.mxu3 %v98_v40 }
  0x2e   :  { %180 = vmatpush.msra.mxu1 %v153_v31  ;;  %227 = vmatpush.msra.mxu2 %v202_v41 }
  0x2f   :  { %122 = vmatpush.msra.mxu0 %v97_v42  ;;  %283 = vmatpush.msra.mxu3 %v97_v42 }
  0x30   :  { %181 = vmatpush.msra.mxu1 %v152_v34  ;;  %228 = vmatpush.msra.mxu2 %v201_v43 }
  0x31   :  { %123 = vmatpush.msra.mxu0 %v96_v44  ;;  %284 = vmatpush.msra.mxu3 %v96_v44 }
  0x32   :  { %182 = vmatpush.msra.mxu1 %v151_v37  ;;  %229 = vmatpush.msra.mxu2 %v200_v45 }
  0x33   :  { %183 = vmatmul.f32.vlgmr.msra.gmra.mxu1 %v149_v39  ;;  %124 = vmatpush.msra.mxu0 %v95_v48 }
  0x34   :  { %230 = vmatpush.msra.mxu2 %v199_v47  ;;  %285 = vmatpush.msra.mxu3 %v95_v48 }
  0x35   :  { %125 = vmatpush.msra.mxu0 %v94_v49 }
  0x36   :  { %286 = vmatpush.msra.mxu3 %v94_v49  ;;  %126 = vmatmul.f32.vlgmr.msra.gmra.mxu0 %v149_v39 }
  0x37   :  { %129 = vmatmul.f32.vlgmr.msra.gmra.mxu3 %v150_v46 }
  0x3b   :  { %186 = vmatmul.f32.gmra.mxu1 %v150_v46 }
  0xb0   :  { %v184_v50 = vpop.f32.mrf.mxu1 }
  0xb1   :  { %231 = vmatmul.f32.vlgmr.msra.gmra.mxu2 %v184_v50 }
  0xb3   :  { %v127_v53 = vpop.f32.mrf.mxu0 }
  0xb4   :  { %v244_v54 = vadd.f32 %v294_v52, %v127_v53 }
  0xb8   :  { %v187_v51 = vpop.f32.mrf.mxu1 }
  0xb9   :  { %234 = vmatmul.f32.gmra.mxu2 %v187_v51 }
  0xba   :  { %v130_v57 = vpop.f32.mrf.mxu3 }
  0xbb   :  { %v245_v58 = vadd.f32 %v294_v52, %v130_v57 }
 0x134   :  { %v232_v55 = vpop.f32.mrf.mxu2 }
 0x135   :  { %v246_v56 = vadd.f32 %v244_v54, %v232_v55 }
 0x137   :  { %248 = vst [vmem:[#allocation12] sm:$0xff] %v246_v56 }
 0x13c   :  { %v235_v59 = vpop.f32.mrf.mxu2 }
 0x13d   :  { %v247_v60 = vadd.f32 %v245_v58, %v235_v59 }
 0x13f   :  { %249 = vst [vmem:[#allocation12 + $0x8] sm:$0xff] %v247_v60 }
 0x140   :  { %262 = dma.vmem_to_hbm [thread:$0]  %s255_s14, 256, %s257_s17, [#allocation6], %s424_s26, %s424_s26, %s425_s27  }
 0x141   :  { %421 = dma.done.wait [#allocation6], 256  }
 0x142   :  { %422 = vsyncadd [#allocation6], 4294967040 }
 0x143   :  { %267 = vsyncpa [#allocation5], 1 }
 0x144   :  { %268 = vsyncpa [#allocation8], 1 }
 0x145   :  { %269 = vsyncpa [#allocation11], 1 }
 0x146   :  { %270 = vsyncpa [#allocation6], 1 }

</bundles_post_ra>
